<compile_context>
chip_gen: v7x
topology: tpu7x:2x2x1
jax: 0.10.0
libtpu: 0.0.40
codegen_flags: <defaults>
</compile_context>

<pallas_src>
import functools

import jax
import jax.numpy as jnp
from jax.experimental import pallas as pl
from jax.experimental.pallas import tpu as pltpu


_MAX_BLOCK_ROWS = 1024                 # bounds the 128-lane-padded (rows, 1) windows
_TILE_BYTES_CAP = 16 * 1024 * 1024     # gains flatten past ~8-16 MiB per tile


def _vmem_capacity_bytes():
    """Physical VMEM per TensorCore; conservative (v7x) fallback if unknown."""
    try:
        return int(pltpu.get_tpu_info().vmem_capacity_bytes)
    except Exception:
        return 64 * 1024 * 1024


def _choose_tiles(nc, hw, itemsize, target_bytes):
    """Pick (block_rows, block_hw) that evenly divide (nc, hw) such that:
       * block_hw is a multiple of 128 (or hw itself when hw % 128 != 0),
       * block_rows is a multiple of the dtype-native sublane count
         (8 f32 / 16 bf16 / 32 int8) or nc itself,
       * block_rows * block_hw * itemsize <= target_bytes whenever possible,
       * >= 2 row-blocks remain when possible (v7x megacore sharding),
       * ties go to the largest, most lane-dense block (contiguous HBM reads).
    """
    sub = max(8, 32 // itemsize)

    if hw % 128 == 0:
        lane_cands = [d for d in range(128, hw + 1, 128) if hw % d == 0]
    else:
        lane_cands = [hw]                        # full dim is always layout-legal

    max_rows = min(nc, _MAX_BLOCK_ROWS)
    row_cands = [d for d in range(sub, max_rows + 1, sub) if nc % d == 0]
    if not row_cands:
        # TODO(synk): a masked cdiv grid would avoid whole-dim blocks when nc
        # has no sublane-aligned divisor; the full-dim fallback is fine at
        # typical N*C and the vmem limit below is sized from the actual block.
        row_cands = [nc]

    pairs = [(r, l) for r in row_cands for l in lane_cands]
    fitting = [p for p in pairs if p[0] * p[1] * itemsize <= target_bytes]
    if fitting:
        def key(p):
            r, l = p
            return ((nc // r) >= 2, r * l, l)
        return max(fitting, key=key)
    # Nothing fits the budget (huge, non-128-divisible spatial dim): take the
    # smallest legal block and let the wrapper raise vmem_limit accordingly.
    return min(pairs, key=lambda p: p[0] * p[1])


def _stats_kernel(x_ref, center_ref, sum_ref, sumsq_ref):
    """Accumulate per-(n, c) sums of (x - center) and (x - center)^2 in f32.

    Output blocks are resident across the inner ("arbitrary") H*W-block axis,
    so they double as the accumulators (no scratch buffer needed)."""
    @pl.when(pl.program_id(1) == 0)
    def _():
        sum_ref[...] = jnp.zeros_like(sum_ref)
        sumsq_ref[...] = jnp.zeros_like(sumsq_ref)

    xc = x_ref[...].astype(jnp.float32) - center_ref[...]
    sum_ref[...] += jnp.sum(xc, axis=1, keepdims=True)
    sumsq_ref[...] += jnp.sum(xc * xc, axis=1, keepdims=True)


def _apply_kernel(x_ref, scale_ref, shift_ref, o_ref):
    """y = x * scale[row] + shift[row]; scale/shift already fold mean, var,
    eps and the affine weight/bias, so this is one FMA per element."""
    x = x_ref[...].astype(jnp.float32)
    o_ref[...] = (x * scale_ref[...] + shift_ref[...]).astype(o_ref.dtype)


@functools.partial(jax.jit,
                   static_argnames=("estimate_mean", "estimate_var", "eps"))
def partly_adaptive_bn(x_nchw, weight, bias, source_mean, source_var, *,
                       estimate_mean=True, estimate_var=True, eps=1e-5):
    n, c, h, w = x_nchw.shape
    hw = h * w
    nc = n * c
    m = n * hw
    f32 = jnp.float32
    itemsize = x_nchw.dtype.itemsize

    # Generation-aware budgets: keep pass-2's steady-state working set
    # (double-buffered input + output tiles = 4 tiles) at <= ~50% of VMEM.
    vmem_cap = _vmem_capacity_bytes()
    target_bytes = max(1 << 20, min(_TILE_BYTES_CAP, vmem_cap // 8))

    # Free view of the row-major NCHW buffer: no transpose, lanes = spatial.
    x2d = x_nchw.reshape(nc, hw)
    block_rows, block_hw = _choose_tiles(nc, hw, itemsize, target_bytes)
    assert nc % block_rows == 0 and hw % block_hw == 0
    grid = (nc // block_rows, hw // block_hw)

    # vmem_limit from the actual working set (+25% headroom), capped to HW.
    tile_bytes = block_rows * block_hw * itemsize
    stat_window = block_rows * 512          # (rows, 1) f32 padded to 128 lanes
    pass1_ws = 2 * tile_bytes + 6 * stat_window
    pass2_ws = 4 * tile_bytes + 4 * stat_window
    vmem_limit = int(max(pass1_ws, pass2_ws) * 1.25) + (2 << 20)
    vmem_limit = max(16 << 20, min(vmem_limit, int(vmem_cap * 0.9)))

    # Per-row (row r -> channel r % C) centering value for pass 1.
    center_ch = source_mean.astype(f32)
    center_rows = jnp.tile(center_ch, n).reshape(nc, 1)

    # ---- Pass 1: per-(n, c) centered sum / sum-of-squares over H*W. ----
    row_sum, row_sumsq = pl.pallas_call(
        _stats_kernel,
        out_shape=(jax.ShapeDtypeStruct((nc, 1), f32),
                   jax.ShapeDtypeStruct((nc, 1), f32)),
        grid_spec=pltpu.PrefetchScalarGridSpec(
            num_scalar_prefetch=0,
            grid=grid,
            in_specs=[pl.BlockSpec((block_rows, block_hw), lambda r, k: (r, k)),
                      pl.BlockSpec((block_rows, 1), lambda r, k: (r, 0))],
            out_specs=[pl.BlockSpec((block_rows, 1), lambda r, k: (r, 0)),
                       pl.BlockSpec((block_rows, 1), lambda r, k: (r, 0))]),
        compiler_params=pltpu.CompilerParams(
            dimension_semantics=("parallel", "arbitrary"),
            vmem_limit_bytes=vmem_limit),
    )(x2d, center_rows)

    # ---- Tiny O(N*C) glue: rows -> channels, fold into scale / shift. ----
    s1 = row_sum.reshape(n, c).sum(axis=0)       # sum of (x - center) per channel
    s2 = row_sumsq.reshape(n, c).sum(axis=0)     # sum of (x - center)^2
    m_f = f32(m)
    batch_mean = center_ch + s1 / m_f
    batch_var = jnp.maximum(s2 - s1 * s1 / m_f, 0.0) / f32(max(m - 1, 1))
    mean = batch_mean if estimate_mean else center_ch
    var = batch_var if estimate_var else source_var.astype(f32)
    scale = weight.astype(f32) * jax.lax.rsqrt(var + f32(eps))
    shift = bias.astype(f32) - mean * scale
    scale_rows = jnp.tile(scale, n).reshape(nc, 1)
    shift_rows = jnp.tile(shift, n).reshape(nc, 1)

    # ---- Pass 2: normalize + affine as one FMA over lane-dense tiles. ----
    y2d = pl.pallas_call(
        _apply_kernel,
        out_shape=jax.ShapeDtypeStruct((nc, hw), x_nchw.dtype),
        grid_spec=pltpu.PrefetchScalarGridSpec(
            num_scalar_prefetch=0,
            grid=grid,
            in_specs=[pl.BlockSpec((block_rows, block_hw), lambda r, k: (r, k)),
                      pl.BlockSpec((block_rows, 1), lambda r, k: (r, 0)),
                      pl.BlockSpec((block_rows, 1), lambda r, k: (r, 0))],
            out_specs=pl.BlockSpec((block_rows, block_hw), lambda r, k: (r, k))),
        compiler_params=pltpu.CompilerParams(
            dimension_semantics=("parallel", "parallel"),
            vmem_limit_bytes=vmem_limit),
    )(x2d, scale_rows, shift_rows)

    # Free reshape back to NCHW.
    return y2d.reshape(n, c, h, w)


def _reference(x, weight, bias, source_mean, source_var,
               estimate_mean, estimate_var, eps):
    batch_mean = jnp.mean(x, axis=(0, 2, 3))
    batch_var = jnp.var(x, axis=(0, 2, 3), ddof=1)
    mean = batch_mean if estimate_mean else source_mean
    var = batch_var if estimate_var else source_var
    mean = mean[None, :, None, None]
    var = var[None, :, None, None]
    wgt = weight[None, :, None, None]
    bse = bias[None, :, None, None]
    return (x - mean) / jnp.sqrt(var + eps) * wgt + bse


if __name__ == "__main__":
    key = jax.random.PRNGKey(0)
    k_x, k_w, k_b, k_m, k_v = jax.random.split(key, 5)

    N, C, H, W = 2, 4, 16, 16
    eps = 1e-5  # nn.BatchNorm2d default

    x = jax.random.normal(k_x, (N, C, H, W), dtype=jnp.float32)
    weight = jax.random.normal(k_w, (C,), dtype=jnp.float32)
    bias = jax.random.normal(k_b, (C,), dtype=jnp.float32)
    source_mean = jax.random.normal(k_m, (C,), dtype=jnp.float32)
    source_var = jax.random.uniform(k_v, (C,), minval=0.5, maxval=1.5,
                                    dtype=jnp.float32)

    for est_mean in (True, False):
        for est_var in (True, False):
            out = partly_adaptive_bn(x, weight, bias, source_mean, source_var,
                                     estimate_mean=est_mean,
                                     estimate_var=est_var, eps=eps)
            out = jax.block_until_ready(out)
            ref = _reference(x, weight, bias, source_mean, source_var,
                             est_mean, est_var, eps)
            assert out.shape == (N, C, H, W)
            assert jnp.allclose(out, ref, rtol=1e-5, atol=1e-5), \
                (f"mismatch vs reference (estimate_mean={est_mean}, "
                 f"estimate_var={est_var})")

    print("KERNEL_OK")
</pallas_src>

<mosaic_0001>
module attributes {stable_mosaic.version = 11 : i64} {
  func.func @_stats_kernel(%arg0: i32, %arg1: i32, %arg2: memref<8x256xf32, #tpu.memory_space<vmem>>, %arg3: memref<8x1xf32, #tpu.memory_space<vmem>>, %arg4: memref<8x1xf32, #tpu.memory_space<vmem>>, %arg5: memref<8x1xf32, #tpu.memory_space<vmem>>) attributes {dimension_semantics = [#tpu.dimension_semantics<parallel>, #tpu.dimension_semantics<arbitrary>], iteration_bounds = array<i64: 1, 1>, scalar_prefetch = 0 : i64, scratch_operands = 0 : i64, tpu.core_type = #tpu.core_type<tc>, window_params = [{transform_indices = @transform_0, window_bounds = array<i64: 8, 256>}, {transform_indices = @transform_1, window_bounds = array<i64: 8, 1>}, {transform_indices = @transform_2, window_bounds = array<i64: 8, 1>}, {transform_indices = @transform_3, window_bounds = array<i64: 8, 1>}]} {
    %c0_i32 = arith.constant 0 : i32
    %0 = arith.cmpi eq, %arg1, %c0_i32 : i32
    %1 = arith.extui %0 : i1 to i32
    %c0_i32_0 = arith.constant 0 : i32
    %2 = arith.cmpi ne, %1, %c0_i32_0 : i32
    scf.if %2 {
      %cst_13 = arith.constant 0.000000e+00 : f32
      %18 = vector.broadcast %cst_13 : f32 to vector<8x1xf32>
      %c0_14 = arith.constant 0 : index
      %c0_15 = arith.constant 0 : index
      %19 = vector.load %arg4[%c0_14, %c0_15] : memref<8x1xf32, #tpu.memory_space<vmem>>, vector<8x1xf32>
      tpu.vector_store %arg4[%c0_14, %c0_15], %18 {strides = array<i32>} : memref<8x1xf32, #tpu.memory_space<vmem>>, vector<8x1xf32>,
      %cst_16 = arith.constant 0.000000e+00 : f32
      %20 = vector.broadcast %cst_16 : f32 to vector<8x1xf32>
      %c0_17 = arith.constant 0 : index
      %c0_18 = arith.constant 0 : index
      %21 = vector.load %arg5[%c0_17, %c0_18] : memref<8x1xf32, #tpu.memory_space<vmem>>, vector<8x1xf32>
      tpu.vector_store %arg5[%c0_17, %c0_18], %20 {strides = array<i32>} : memref<8x1xf32, #tpu.memory_space<vmem>>, vector<8x1xf32>,
    } else {
    }
    %c0 = arith.constant 0 : index
    %c0_1 = arith.constant 0 : index
    %3 = vector.load %arg2[%c0, %c0_1] : memref<8x256xf32, #tpu.memory_space<vmem>>, vector<8x256xf32>
    %c0_2 = arith.constant 0 : index
    %c0_3 = arith.constant 0 : index
    %4 = vector.load %arg3[%c0_2, %c0_3] : memref<8x1xf32, #tpu.memory_space<vmem>>, vector<8x1xf32>
    %5 = vector.broadcast %4 : vector<8x1xf32> to vector<8x256xf32>
    %6 = arith.subf %3, %5 : vector<8x256xf32>
    %c0_4 = arith.constant 0 : index
    %c0_5 = arith.constant 0 : index
    %7 = vector.load %arg4[%c0_4, %c0_5] : memref<8x1xf32, #tpu.memory_space<vmem>>, vector<8x1xf32>
    %cst = arith.constant dense<0.000000e+00> : vector<8xf32>
    %8 = vector.multi_reduction <add>, %6, %cst [1] : vector<8x256xf32> to vector<8xf32>
    %9 = vector.shape_cast %8 : vector<8xf32> to vector<8x1xf32>
    %10 = arith.addf %7, %9 : vector<8x1xf32>
    %c0_6 = arith.constant 0 : index
    %c0_7 = arith.constant 0 : index
    %11 = vector.load %arg4[%c0_6, %c0_7] : memref<8x1xf32, #tpu.memory_space<vmem>>, vector<8x1xf32>
    tpu.vector_store %arg4[%c0_6, %c0_7], %10 {strides = array<i32>} : memref<8x1xf32, #tpu.memory_space<vmem>>, vector<8x1xf32>,
    %c0_8 = arith.constant 0 : index
    %c0_9 = arith.constant 0 : index
    %12 = vector.load %arg5[%c0_8, %c0_9] : memref<8x1xf32, #tpu.memory_space<vmem>>, vector<8x1xf32>
    %13 = arith.mulf %6, %6 : vector<8x256xf32>
    %cst_10 = arith.constant dense<0.000000e+00> : vector<8xf32>
    %14 = vector.multi_reduction <add>, %13, %cst_10 [1] : vector<8x256xf32> to vector<8xf32>
    %15 = vector.shape_cast %14 : vector<8xf32> to vector<8x1xf32>
    %16 = arith.addf %12, %15 : vector<8x1xf32>
    %c0_11 = arith.constant 0 : index
    %c0_12 = arith.constant 0 : index
    %17 = vector.load %arg5[%c0_11, %c0_12] : memref<8x1xf32, #tpu.memory_space<vmem>>, vector<8x1xf32>
    tpu.vector_store %arg5[%c0_11, %c0_12], %16 {strides = array<i32>} : memref<8x1xf32, #tpu.memory_space<vmem>>, vector<8x1xf32>,
    return
  }
  func.func @transform_0(%arg0: i32, %arg1: i32) -> (i32, i32) {
    %c0_i32 = arith.constant 0 : i32
    return %arg0, %arg1 : i32, i32
  }
  func.func @transform_1(%arg0: i32, %arg1: i32) -> (i32, i32) {
    %c0_i32 = arith.constant 0 : i32
    %c0_i32_0 = arith.constant 0 : i32
    return %arg0, %c0_i32 : i32, i32
  }
  func.func @transform_2(%arg0: i32, %arg1: i32) -> (i32, i32) {
    %c0_i32 = arith.constant 0 : i32
    %c0_i32_0 = arith.constant 0 : i32
    return %arg0, %c0_i32 : i32, i32
  }
  func.func @transform_3(%arg0: i32, %arg1: i32) -> (i32, i32) {
    %c0_i32 = arith.constant 0 : i32
    %c0_i32_0 = arith.constant 0 : i32
    return %arg0, %c0_i32 : i32, i32
  }
}

module attributes {stable_mosaic.version = 11 : i64} {
  func.func @_apply_kernel(%arg0: i32, %arg1: i32, %arg2: memref<8x256xf32, #tpu.memory_space<vmem>>, %arg3: memref<8x1xf32, #tpu.memory_space<vmem>>, %arg4: memref<8x1xf32, #tpu.memory_space<vmem>>, %arg5: memref<8x256xf32, #tpu.memory_space<vmem>>) attributes {dimension_semantics = [#tpu.dimension_semantics<parallel>, #tpu.dimension_semantics<parallel>], iteration_bounds = array<i64: 1, 1>, scalar_prefetch = 0 : i64, scratch_operands = 0 : i64, tpu.core_type = #tpu.core_type<tc>, window_params = [{transform_indices = @transform_0, window_bounds = array<i64: 8, 256>}, {transform_indices = @transform_1, window_bounds = array<i64: 8, 1>}, {transform_indices = @transform_2, window_bounds = array<i64: 8, 1>}, {transform_indices = @transform_3, window_bounds = array<i64: 8, 256>}]} {
    %c0 = arith.constant 0 : index
    %c0_0 = arith.constant 0 : index
    %0 = vector.load %arg2[%c0, %c0_0] : memref<8x256xf32, #tpu.memory_space<vmem>>, vector<8x256xf32>
    %c0_1 = arith.constant 0 : index
    %c0_2 = arith.constant 0 : index
    %1 = vector.load %arg3[%c0_1, %c0_2] : memref<8x1xf32, #tpu.memory_space<vmem>>, vector<8x1xf32>
    %2 = vector.broadcast %1 : vector<8x1xf32> to vector<8x256xf32>
    %3 = arith.mulf %0, %2 : vector<8x256xf32>
    %c0_3 = arith.constant 0 : index
    %c0_4 = arith.constant 0 : index
    %4 = vector.load %arg4[%c0_3, %c0_4] : memref<8x1xf32, #tpu.memory_space<vmem>>, vector<8x1xf32>
    %5 = vector.broadcast %4 : vector<8x1xf32> to vector<8x256xf32>
    %6 = arith.addf %3, %5 : vector<8x256xf32>
    %c0_5 = arith.constant 0 : index
    %c0_6 = arith.constant 0 : index
    %7 = vector.load %arg5[%c0_5, %c0_6] : memref<8x256xf32, #tpu.memory_space<vmem>>, vector<8x256xf32>
    tpu.vector_store %arg5[%c0_5, %c0_6], %6 {strides = array<i32>} : memref<8x256xf32, #tpu.memory_space<vmem>>, vector<8x256xf32>,
    return
  }
  func.func @transform_0(%arg0: i32, %arg1: i32) -> (i32, i32) {
    %c0_i32 = arith.constant 0 : i32
    return %arg0, %arg1 : i32, i32
  }
  func.func @transform_1(%arg0: i32, %arg1: i32) -> (i32, i32) {
    %c0_i32 = arith.constant 0 : i32
    %c0_i32_0 = arith.constant 0 : i32
    return %arg0, %c0_i32 : i32, i32
  }
  func.func @transform_2(%arg0: i32, %arg1: i32) -> (i32, i32) {
    %c0_i32 = arith.constant 0 : i32
    %c0_i32_0 = arith.constant 0 : i32
    return %arg0, %c0_i32 : i32, i32
  }
  func.func @transform_3(%arg0: i32, %arg1: i32) -> (i32, i32) {
    %c0_i32 = arith.constant 0 : i32
    return %arg0, %arg1 : i32, i32
  }
}

</mosaic_0001>

<bundles_post_ra>
// kernel: tile.0
= control target key start
LH: loop header
LB: loop body
LE: loop exit
PB: predicated region body
PF: predicated region fallthrough
CT: control target
= control target key end

     0   :  { %s34_s8 = smov 125   ;;  %vm7_vm0 = vcmask 7168   ;;  %s35_s11 = smov 126   ;;  %s61_s0 = inlined_call_operand.vmem [shape: f32[2,4], index: 0, kind: input, shape index: {}]   ;;  %s62_s1 = inlined_call_operand.vmem [shape: f32[8,1], index: 1, kind: output, shape index: {}]  }
   0x1   :  { %v4_v0 = vld [vmem:[%s61_s0] sm:$0x3]  ;;  %s33_s0 = smov 127  }
   0x2   :  { %5 = vst [vmem:[#allocation0] sm:$0x3] %v4_v0 }
   0x9   :  { %v9_v1 = vld [vmem:[#allocation0] sm:$0x3]  }
   0xa   :  { %v21_v2 = vld [vmem:[#allocation0] sm:$0x3]   ;;  %10 = vrot.lane.b32.xlu0 %v9_v1, %s33_s0 }
   0xb   :  { %22 = vrot.lane.b32.xlu1 %v21_v2, %s34_s8  ;;  %v6_v3 = vld [vmem:[#allocation0] sm:$0x3]  }
   0xc   :  { %v15_v4 = vld [vmem:[#allocation0] sm:$0x3]   ;;  %8 = vst.msk [vmem:[%s62_s1] ss:$4 sm:$0x3] %vm7_vm0, %v6_v3  }
   0xe   :  { %16 = vrot.lane.b32.xlu0 %v15_v4, %s35_s11 }
  0x7c   :  { %v11_v5 = vpop.permute.xlu0 %10  }
  0x7d   :  { %v23_v6 = vpop.permute.xlu1 %22   ;;  %27 = vst.msk [vmem:[%s62_s1 + $0x1] ss:$4 sm:$0x3] %vm7_vm0, %v11_v5  }
  0x7e   :  { %29 = vst.msk [vmem:[%s62_s1 + $0x3] ss:$4 sm:$0x3] %vm7_vm0, %v23_v6  }
  0x80   :  { %v17_v7 = vpop.permute.xlu0 %16  }
  0x81   :  { %28 = vst.msk [vmem:[%s62_s1 + $0x2] ss:$4 sm:$0x3] %vm7_vm0, %v17_v7  }

// kernel: tile.18
= control target key start
LH: loop header
LB: loop body
LE: loop exit
PB: predicated region body
PF: predicated region fallthrough
CT: control target
= control target key end

     0   :  { %s22_s0 = inlined_call_operand.vmem [shape: f32[4], index: 0, kind: input, shape index: {}]   ;;  %s23_s1 = inlined_call_operand.vmem [shape: f32[2,4], index: 1, kind: output, shape index: {}]  }
   0x1   :  { %v4_v0 = vld [vmem:[%s22_s0] ss:$0 sm:$0xff] }
   0x2   :  { %5 = vst [vmem:[%s23_s1] sm:$0x3] %v4_v0 }

// kernel: partly_adaptive_bn.2
= control target key start
LH: loop header
LB: loop body
LE: loop exit
PB: predicated region body
PF: predicated region fallthrough
CT: control target
= control target key end

     0   :  { %v56_v0 = vmov 0   ;;  %vm17_vm0 = vcmask 7168   ;;  %v57_v2 = vmov 0.0   ;;  %s109_s1 = inlined_call_operand.vmem [shape: f32[8,1], index: 1, kind: input, shape index: {}]   ;;  %s110_s2 = inlined_call_operand.vmem [shape: f32[8,1], index: 2, kind: output, shape index: {0}]   ;;  %s111_s0 = inlined_call_operand.vmem [shape: f32[8,256], index: 0, kind: input, shape index: {}]   ;;  %s112_s3 = inlined_call_operand.vmem [shape: f32[8,1], index: 3, kind: output, shape index: {1}]  }
   0x1   :  { %55 = vset.pattern.permute.xlu0 %v56_v0  ;;  %v22_v1 = vld [vmem:[%s109_s1] sm:$0xff]  ;;  %18 = vst.msk [vmem:[%s110_s2] sm:$0xff] %vm17_vm0, %v57_v2  ;;  %v21_v4 = vld [vmem:[%s111_s0 + $0x8] sm:$0xff]  ;;  %19 = vst.msk [vmem:[%s112_s3] sm:$0xff] %vm17_vm0, %v57_v2 }
   0x2   :  { %25 = vperm.xlu0 %55, %v22_v1   ;;  %v20_v3 = vld [vmem:[%s111_s0] sm:$0xff] }
   0x8   :  { %v30_v12 = vld [vmem:[%s110_s2] sm:$0xff] }
   0x9   :  { %v37_v14 = vld [vmem:[%s112_s3] sm:$0xff] }
  0x81   :  { %v26_v5 = vpop.permute.xlu0 %25 }
  0x82   :  { %v28_v6 = vsub.f32 %v20_v3, %v26_v5  ;;  %v29_v7 = vsub.f32 %v21_v4, %v26_v5 }
  0x84   :  { %v31_v8 = vadd.f32 %v29_v7, %v28_v6  ;;  %v38_v9 = vmul.f32 %v28_v6, %v28_v6  ;;  %v39_v10 = vmul.f32 %v29_v7, %v29_v7 }
  0x86   :  { %32 = vadd.xlane.f32.xlu0 %v31_v8  ;;  %v40_v11 = vadd.f32 %v39_v10, %v38_v9 }
  0x88   :  { %41 = vadd.xlane.f32.xlu1 %v40_v11 }
 0x113   :  { %v33_v13 = vpop.xlane.xlu0 %32 }
 0x114   :  { %v34_v15 = vadd.f32 %v33_v13, %v30_v12 }
 0x115   :  { %v42_v16 = vpop.xlane.xlu1 %41 }
 0x116   :  { %36 = vst.msk [vmem:[%s110_s2] sm:$0xff] %vm17_vm0, %v34_v15  ;;  %v43_v17 = vadd.f32 %v42_v16, %v37_v14 }
 0x118   :  { %44 = vst.msk [vmem:[%s112_s3] sm:$0xff] %vm17_vm0, %v43_v17 }

// kernel: partly_adaptive_bn.3
= control target key start
LH: loop header
LB: loop body
LE: loop exit
PB: predicated region body
PF: predicated region fallthrough
CT: control target
= control target key end

     0   :  { %v40_v0 = vmov 0   ;;  %s79_s1 = inlined_call_operand.vmem [shape: f32[8,1], index: 1, kind: input, shape index: {}]   ;;  %s80_s2 = inlined_call_operand.vmem [shape: f32[8,1], index: 2, kind: input, shape index: {}]   ;;  %s81_s0 = inlined_call_operand.vmem [shape: f32[8,256], index: 0, kind: input, shape index: {}]   ;;  %s82_s3 = inlined_call_operand.vmem [shape: f32[8,256], index: 3, kind: output, shape index: {}]  }
   0x1   :  { %39 = vset.pattern.permute.xlu0 %v40_v0  ;;  %v16_v1 = vld [vmem:[%s79_s1] sm:$0xff]  ;;  %v15_v5 = vld [vmem:[%s81_s0 + $0x8] sm:$0xff] }
   0x2   :  { %19 = vperm.xlu0 %39, %v16_v1   ;;  %v24_v2 = vld [vmem:[%s80_s2] sm:$0xff] }
   0x3   :  { %v14_v4 = vld [vmem:[%s81_s0] sm:$0xff] }
   0x6   :  { %27 = vperm.xlu0 %39, %v24_v2  }
  0x81   :  { %v20_v3 = vpop.permute.xlu0 %19 }
  0x82   :  { %v22_v6 = vmul.f32 %v20_v3, %v14_v4  ;;  %v23_v7 = vmul.f32 %v20_v3, %v15_v5 }
  0x85   :  { %v28_v8 = vpop.permute.xlu0 %27 }
  0x86   :  { %v30_v9 = vadd.f32 %v28_v8, %v22_v6  ;;  %v31_v10 = vadd.f32 %v28_v8, %v23_v7 }
  0x88   :  { %32 = vst [vmem:[%s82_s3] sm:$0xff] %v30_v9  ;;  %33 = vst [vmem:[%s82_s3 + $0x8] sm:$0xff] %v31_v10 }

</bundles_post_ra>
